<compile_context>
chip_gen: v6e
topology: v6e:2x2x1
jax: 0.10.0
libtpu: 0.0.40
codegen_flags: <defaults>
</compile_context>

<pallas_src>
import functools

import jax
import jax.numpy as jnp
from jax import lax
from jax.experimental import pallas as pl
from jax.experimental.pallas import tpu as pltpu

_BN_EPS = 1e-5
_VMEM_LIMIT_BYTES = 64 * 1024 * 1024  # safe on v5e/v6e (128 MiB) and v7x (64 MiB per TC)


def _apply_activation(y, activation):
    if activation == "relu":
        return jnp.maximum(y, 0.0)
    if activation == "relu6":
        return jnp.clip(y, 0.0, 6.0)
    if activation == "elu":
        return jnp.where(y > 0, y, jnp.expm1(y))
    if activation == "leaky_relu":
        return jnp.where(y > 0, y, 0.01 * y)
    return y  # activation is None


def _fused_linear_kernel(*refs, use_bn, activation):
    """Linear (+bias if no BN) -> optional BatchNorm1d (training-mode stats) -> activation.

    Ref order:
      use_bn=True : (x, w, gamma, beta, out)   (bias dropped: train-mode BN cancels it)
      use_bn=False: (x, w, b, out)
    All post-matmul math runs in f32 regardless of MXU input dtype (v5e has no bf16
    VALU/EUP; BN variance at eps=1e-5 needs f32 anyway).
    """
    if use_bn:
        x_ref, w_ref, gamma_ref, beta_ref, o_ref = refs
    else:
        x_ref, w_ref, b_ref, o_ref = refs

    # MXU matmul with f32 accumulation.
    y = jnp.dot(x_ref[...], w_ref[...], preferred_element_type=jnp.float32)

    if use_bn:
        # BatchNorm1d, training mode: biased batch statistics over the batch axis.
        # Fold mean / rsqrt / gamma / beta into a single per-column scale & shift so the
        # (B, N)-wide epilogue is one fused multiply-add on the VPU.
        mean = jnp.mean(y, axis=0, keepdims=True)                       # (1, N)
        var = jnp.mean(jnp.square(y - mean), axis=0, keepdims=True)     # (1, N)
        scale = gamma_ref[...] * lax.rsqrt(var + _BN_EPS)               # rsqrt -> EUP slot
        shift = beta_ref[...] - mean * scale                            # bias is cancelled by BN
        y = y * scale + shift
    else:
        y = y + b_ref[...]                                              # (B, N) + (1, N)

    y = _apply_activation(y, activation)

    # dropout_rate <= 0 in this config -> identity.
    # TODO(synk): training-mode dropout would need pltpu.prng_seed / pltpu.prng_random_bits.
    o_ref[...] = y.astype(o_ref.dtype)


def custom_linear_layer(x, w, b=None, gamma=None, beta=None, *,
                        use_bn=True, activation="relu", dropout_rate=-1.0,
                        block_n=512, mxu_input_dtype=None):
    """Fused CustomLinearLayer forward. x: (B, D_in), w: (D_in, D_out)."""
    del dropout_rate  # <= 0 in this config: identity.
    B, D_in = x.shape
    D_out = w.shape[1]
    out_dtype = x.dtype

    if mxu_input_dtype is not None:
        # bf16 MXU inputs: fast MXU path on v6e/v7x, halves the weight DMA bytes.
        # Accumulation + BN/activation stay in f32 inside the kernel.
        x = x.astype(mxu_input_dtype)
        w = w.astype(mxu_input_dtype)

    if use_bn:
        params = (gamma.reshape(1, D_out).astype(jnp.float32),
                  beta.reshape(1, D_out).astype(jnp.float32))
    else:
        params = (b.reshape(1, D_out).astype(jnp.float32),)

    kernel = functools.partial(_fused_linear_kernel, use_bn=use_bn,
                               activation=activation)
    out_shape = jax.ShapeDtypeStruct((B, D_out), out_dtype)

    if D_out <= block_n:
        # Small / medium shapes: single grid-less invocation, everything resident in VMEM,
        # no per-grid-step overhead.
        return pl.pallas_call(
            kernel,
            out_shape=out_shape,
            compiler_params=pltpu.CompilerParams(
                vmem_limit_bytes=_VMEM_LIMIT_BYTES),
        )(x, w, *params)

    # Large D_out: tile only the N axis so the (only large) weight DMA pipelines against
    # the MXU. The full batch stays inside every block so the axis-0 mean/var is exact —
    # do NOT tile the batch axis with this kernel structure.
    grid = (pl.cdiv(D_out, block_n),)
    param_spec = pl.BlockSpec((1, block_n), lambda j: (0, j))
    in_specs = [
        pl.BlockSpec((B, D_in), lambda j: (0, 0)),
        pl.BlockSpec((D_in, block_n), lambda j: (0, j)),
    ] + [param_spec] * len(params)
    return pl.pallas_call(
        kernel,
        out_shape=out_shape,
        grid_spec=pltpu.PrefetchScalarGridSpec(
            num_scalar_prefetch=0,
            grid=grid,
            in_specs=in_specs,
            out_specs=pl.BlockSpec((B, block_n), lambda j: (0, j)),
        ),
        compiler_params=pltpu.CompilerParams(
            dimension_semantics=("parallel",),  # independent N tiles -> megacore-shardable
            vmem_limit_bytes=_VMEM_LIMIT_BYTES),
    )(x, w, *params)


def _reference(x, w, b, gamma, beta, *, use_bn=True, activation="relu"):
    y = x @ w + b
    if use_bn:
        mean = jnp.mean(y, axis=0, keepdims=True)
        var = jnp.mean((y - mean) ** 2, axis=0, keepdims=True)
        y = (y - mean) / jnp.sqrt(var + _BN_EPS) * gamma + beta
    if activation == "relu":
        y = jnp.maximum(y, 0.0)
    return y


if __name__ == "__main__":
    batch, input_dim = 8, 32

    def make_inputs(k, d_in, d_out):
        kx, kw, kb = jax.random.split(k, 3)
        x = jax.random.normal(kx, (batch, d_in), jnp.float32)
        bound = 1.0 / jnp.sqrt(jnp.float32(d_in))          # nn.Linear-style init
        w = jax.random.uniform(kw, (d_in, d_out), jnp.float32, -bound, bound)
        b = jax.random.uniform(kb, (d_out,), jnp.float32, -bound, bound)
        gamma = jnp.ones((d_out,), jnp.float32)             # BatchNorm1d weight init
        beta = jnp.zeros((d_out,), jnp.float32)              # BatchNorm1d bias init
        return x, w, b, gamma, beta

    # 1) Small shape -> grid-less single-block path (Linear + BN + ReLU).
    x, w, b, gamma, beta = make_inputs(jax.random.PRNGKey(0), input_dim, 128)
    out = jax.block_until_ready(
        custom_linear_layer(x, w, b, gamma, beta, use_bn=True, activation="relu"))
    ref = _reference(x, w, b.reshape(1, -1), gamma.reshape(1, -1), beta.reshape(1, -1))
    assert out.shape == ref.shape
    assert jnp.allclose(out, ref, atol=1e-4, rtol=1e-4)

    # 2) Larger D_out -> N-tiled "parallel" path; full batch per block keeps BN exact.
    x2, w2, b2, g2, be2 = make_inputs(jax.random.PRNGKey(1), input_dim, 512)
    out2 = jax.block_until_ready(
        custom_linear_layer(x2, w2, b2, g2, be2, use_bn=True, activation="relu",
                            block_n=256))
    ref2 = _reference(x2, w2, b2.reshape(1, -1), g2.reshape(1, -1), be2.reshape(1, -1))
    assert jnp.allclose(out2, ref2, atol=1e-4, rtol=1e-4)

    # 3) bf16 MXU inputs with f32 accumulation (v6e / v7x fast MXU path).
    out3 = jax.block_until_ready(
        custom_linear_layer(x, w, b, gamma, beta, use_bn=True, activation="relu",
                            mxu_input_dtype=jnp.bfloat16))
    ref3 = _reference(x.astype(jnp.bfloat16).astype(jnp.float32),
                      w.astype(jnp.bfloat16).astype(jnp.float32),
                      b.reshape(1, -1), gamma.reshape(1, -1), beta.reshape(1, -1))
    assert jnp.allclose(out3, ref3, atol=1e-2, rtol=1e-2)

    # 4) bn=False path (Linear bias + ReLU).
    out4 = jax.block_until_ready(
        custom_linear_layer(x, w, b, gamma, beta, use_bn=False, activation="relu"))
    ref4 = jnp.maximum(x @ w + b.reshape(1, -1), 0.0)
    assert jnp.allclose(out4, ref4, atol=1e-4, rtol=1e-4)

    print("KERNEL_OK")
</pallas_src>

<mosaic_0001>
module attributes {stable_mosaic.version = 11 : i64} {
  func.func @_fused_linear_kernel(%arg0: memref<8x32xf32, #tpu.memory_space<vmem>>, %arg1: memref<32x128xf32, #tpu.memory_space<vmem>>, %arg2: memref<1x128xf32, #tpu.memory_space<vmem>>, %arg3: memref<1x128xf32, #tpu.memory_space<vmem>>, %arg4: memref<8x128xf32, #tpu.memory_space<vmem>>) attributes {dimension_semantics = [], scalar_prefetch = 0 : i64, scratch_operands = 0 : i64, tpu.core_type = #tpu.core_type<tc>} {
    %c0 = arith.constant 0 : index
    %c0_0 = arith.constant 0 : index
    %0 = vector.load %arg0[%c0, %c0_0] : memref<8x32xf32, #tpu.memory_space<vmem>>, vector<8x32xf32>
    %c0_1 = arith.constant 0 : index
    %c0_2 = arith.constant 0 : index
    %1 = vector.load %arg1[%c0_1, %c0_2] : memref<32x128xf32, #tpu.memory_space<vmem>>, vector<32x128xf32>
    %cst = arith.constant dense<0.000000e+00> : vector<8x128xf32>
    %2 = tpu.matmul %0, %1, %cst {dimension_numbers = #tpu.dot_dimension_numbers<[1], [0], [0], [1], [0, 0, 1, 1], [], []>} : vector<8x32xf32>, vector<32x128xf32>, vector<8x128xf32> -> vector<8x128xf32>
    %cst_3 = arith.constant dense<0.000000e+00> : vector<128xf32>
    %3 = vector.multi_reduction <add>, %2, %cst_3 [0] : vector<8x128xf32> to vector<128xf32>
    %4 = vector.shape_cast %3 : vector<128xf32> to vector<1x128xf32>
    %cst_4 = arith.constant 8.000000e+00 : f32
    %5 = vector.broadcast %cst_4 : f32 to vector<1x128xf32>
    %6 = arith.divf %4, %5 : vector<1x128xf32>
    %7 = vector.broadcast %6 : vector<1x128xf32> to vector<8x128xf32>
    %8 = arith.subf %2, %7 : vector<8x128xf32>
    %9 = arith.mulf %8, %8 : vector<8x128xf32>
    %cst_5 = arith.constant dense<0.000000e+00> : vector<128xf32>
    %10 = vector.multi_reduction <add>, %9, %cst_5 [0] : vector<8x128xf32> to vector<128xf32>
    %11 = vector.shape_cast %10 : vector<128xf32> to vector<1x128xf32>
    %cst_6 = arith.constant 8.000000e+00 : f32
    %12 = vector.broadcast %cst_6 : f32 to vector<1x128xf32>
    %13 = arith.divf %11, %12 : vector<1x128xf32>
    %c0_7 = arith.constant 0 : index
    %c0_8 = arith.constant 0 : index
    %14 = vector.load %arg2[%c0_7, %c0_8] : memref<1x128xf32, #tpu.memory_space<vmem>>, vector<1x128xf32>
    %cst_9 = arith.constant 9.99999974E-6 : f32
    %15 = vector.broadcast %cst_9 : f32 to vector<1x128xf32>
    %16 = arith.addf %13, %15 : vector<1x128xf32>
    %17 = math.rsqrt %16 : vector<1x128xf32>
    %18 = arith.mulf %14, %17 : vector<1x128xf32>
    %c0_10 = arith.constant 0 : index
    %c0_11 = arith.constant 0 : index
    %19 = vector.load %arg3[%c0_10, %c0_11] : memref<1x128xf32, #tpu.memory_space<vmem>>, vector<1x128xf32>
    %20 = arith.mulf %6, %18 : vector<1x128xf32>
    %21 = arith.subf %19, %20 : vector<1x128xf32>
    %22 = vector.broadcast %18 : vector<1x128xf32> to vector<8x128xf32>
    %23 = arith.mulf %2, %22 : vector<8x128xf32>
    %24 = vector.broadcast %21 : vector<1x128xf32> to vector<8x128xf32>
    %25 = arith.addf %23, %24 : vector<8x128xf32>
    %cst_12 = arith.constant 0.000000e+00 : f32
    %26 = vector.broadcast %cst_12 : f32 to vector<8x128xf32>
    %27 = arith.maximumf %25, %26 : vector<8x128xf32>
    %c0_13 = arith.constant 0 : index
    %c0_14 = arith.constant 0 : index
    %28 = vector.load %arg4[%c0_13, %c0_14] : memref<8x128xf32, #tpu.memory_space<vmem>>, vector<8x128xf32>
    tpu.vector_store %arg4[%c0_13, %c0_14], %27 {strides = array<i32>} : memref<8x128xf32, #tpu.memory_space<vmem>>, vector<8x128xf32>,
    return
  }
}

</mosaic_0001>

<bundles_post_ra>
// kernel: tpu_custom_call.1
= control target key start
LH: loop header
LB: loop body
LE: loop exit
PB: predicated region body
PF: predicated region fallthrough
CT: control target
= control target key end

     0   :  { %9 = vsyncpa [#allocation3], 0  ;;  %s318_s0 = inlined_call_operand.hbm [shape: f32[8,32], index: 0, kind: input, shape index: {}]   ;;  %s319_s1 = inlined_call_operand.hbm [shape: f32[32,128], index: 1, kind: input, shape index: {}]   ;;  %s320_s2 = inlined_call_operand.vmem [shape: f32[1,128], index: 2, kind: input, shape index: {}]   ;;  %s321_s3 = inlined_call_operand.vmem [shape: f32[1,128], index: 3, kind: input, shape index: {}]   ;;  %s322_s4 = inlined_call_operand.hbm [shape: f32[8,128], index: 4, kind: output, shape index: {}]  }
   0x1   :  { %10 = vsyncpa [#allocation6], 0 }
   0x2   :  { %11 = vsyncpa [#allocation4], 0  ;;  %s271_s15 = smov [#allocation2]   ;;  %s272_s17 = smov [#allocation5]  }
   0x3   :  { %s18_s16 = sshll.u32 %s271_s15, 4  ;;  %s27_s18 = sshll.u32 %s272_s17, 4  ;;  %s19_s16 = int_to_ptr.vmem [resolvable:$true] %s18_s16  ;;  %s28_s18 = int_to_ptr.vmem [resolvable:$true] %s27_s18 }
   0x4   :  { %s213_s19 = scalar_lea.vmem %s19_s16, 128  ;;  %p218_p1 = scmp.lt.s32.totalorder %s19_s16, %s19_s16 }
   0x5   :  { %p214_p0 = scmp.ne.s32.totalorder %s19_s16, %s213_s19  ;;  %p219_p2 = scmp.lt.s32.totalorder %s213_s19, %s213_s19 }
   0x7   :  { %p220_p3 = por %p219_p2, %p218_p1 }
   0x9   :  { %p221_p4 = pnand %p220_p3, %p214_p0 }
   0xb   :  { %224 = shalt.err (!%p221_p4)
}
   0xc   :  { %21 = dma.hbm_to_vmem [thread:$0]  %s318_s0, 128, %s19_s16, [#allocation3]  }
   0xd   :  { %s233_s22 = scalar_lea.vmem %s28_s18, 512  ;;  %p238_p6 = scmp.lt.s32.totalorder %s28_s18, %s28_s18 }
   0xe   :  { %p234_p5 = scmp.ne.s32.totalorder %s28_s18, %s233_s22  ;;  %p239_p7 = scmp.lt.s32.totalorder %s233_s22, %s233_s22 }
  0x10   :  { %p240_p8 = por %p239_p7, %p238_p6 }
  0x12   :  { %p241_p9 = pnand %p240_p8, %p234_p5 }
  0x14   :  { %244 = shalt.err (!%p241_p9)
}
  0x15   :  { %s273_s23 = smov 128   ;;  %s274_s24 = smov 8  }
  0x16   :  { %33 = dma.hbm_to_vmem [thread:$0]  %s319_s1, 512, %s28_s18, [#allocation6], %s273_s23, %s273_s23, %s274_s24  }
  0x17   :  { %265 = dma.done.wait [#allocation3], 128  }
  0x18   :  { %266 = vsyncadd [#allocation3], 4294967168 }
  0x19   :  { %267 = dma.done.wait [#allocation6], 512  }
  0x1a   :  { %268 = vsyncadd [#allocation6], 4294966784  ;;  %v275_v0 = vmov 0.0   ;;  %vm276_vm0 = vmmov 0   ;;  %v48_v1 = vld [vmem:[#allocation5 + $0x18] sm:$0xff]  ;;  %v47_v2 = vld [vmem:[#allocation5 + $0x10] sm:$0xff]  ;;  %v148_v25 = vlaneseq }
  0x1b   :  { %185 = vmatprep.subr.mxu0 %v275_v0  ;;  %193 = vmatprep.mubr.msk.f32.mxu0 %vm276_vm0, %v275_v0  ;;  %v46_v3 = vld [vmem:[#allocation5 + $0x8] sm:$0xff]  ;;  %v45_v4 = vld [vmem:[#allocation5] sm:$0xff]  ;;  %v44_v5 = vld [vmem:[#allocation2] sm:$0xff]  ;;  %vm49_vm1 = vcmask 261120   ;;  %s277_s29 = smov [#allocation7]  }
  0x1c   :  { %186 = vmatpush3.msra.mxu0 %v48_v1  ;;  %v149_v26 = vshrl.u32 %v148_v25, 7  ;;  %v140_v27 = vld [vmem:[%s320_s2] sm:$0x1]  ;;  %s169_s30 = sshll.u32 %s277_s29, 4  ;;  %s170_s30 = int_to_ptr.vmem [resolvable:$true] %s169_s30 }
  0x1d   :  { %187 = vmatprep.subr.mxu0 %v275_v0  ;;  %v144_v31 = vld [vmem:[%s321_s3] sm:$0x1]  ;;  %s245_s5 = scalar_lea.vmem %s170_s30, 128  ;;  %p250_p11 = scmp.lt.s32.totalorder %s170_s30, %s170_s30 }
  0x1e   :  { %188 = vmatpush3.msra.mxu0 %v47_v2  ;;  %v150_v28 = vsub.s32 0, %v149_v26  ;;  %p246_p10 = scmp.ne.s32.totalorder %s170_s30, %s245_s5  ;;  %p251_p12 = scmp.lt.s32.totalorder %s245_s5, %s245_s5 }
  0x1f   :  { %189 = vmatprep.subr.mxu0 %v275_v0 }
  0x20   :  { %190 = vmatpush3.msra.mxu0 %v46_v3  ;;  %p252_p13 = por %p251_p12, %p250_p11 }
  0x21   :  { %191 = vmatprep.subr.mxu0 %v275_v0 }
  0x22   :  { %192 = vmatpush3.msra.mxu0 %v45_v4  ;;  %p253_p0 = pnand %p252_p13, %p246_p10 }
  0x23   :  { %194 = vmatmul.mubr.msk.f32.vlgmr.msra.gmra.mxu0 %vm49_vm1, %v44_v5 }
  0xe3   :  { %v119_v6 = vpop.f32.mrf.mxu0 }
  0xe4   :  { %v123_v7 = vrot.slane %v119_v6, 4 }
  0xe5   :  { %v195_v8 = vpop.f32.mrf.mxu0 }
  0xe6   :  { %v124_v9 = vadd.f32 %v123_v7, %v119_v6 }
  0xe8   :  { %v125_v10 = vrot.slane %v124_v9, 2 }
  0xea   :  { %v126_v11 = vadd.f32 %v125_v10, %v124_v9 }
  0xec   :  { %v127_v12 = vrot.slane %v126_v11, 1 }
  0xee   :  { %v128_v13 = vadd.f32 %v127_v12, %v126_v11 }
  0xf0   :  { %v130_v14 = vmul.f32 0.125, %v128_v13 }
  0xf2   :  { %v131_v15 = vsub.f32 %v119_v6, %v130_v14 }
  0xf4   :  { %v132_v16 = vmul.f32 %v131_v15, %v131_v15 }
  0xf6   :  { %v133_v17 = vrot.slane %v132_v16, 4 }
  0xf8   :  { %v134_v18 = vadd.f32 %v133_v17, %v132_v16 }
  0xfa   :  { %v135_v19 = vrot.slane %v134_v18, 2 }
  0xfc   :  { %v136_v20 = vadd.f32 %v135_v19, %v134_v18 }
  0xfe   :  { %v137_v21 = vrot.slane %v136_v20, 1 }
 0x100   :  { %v138_v22 = vadd.f32 %v137_v21, %v136_v20 }
 0x102   :  { %v139_v23 = vmul.f32 0.125, %v138_v22 }
 0x104   :  { %v141_v24 = vadd.f32 1e-05, %v139_v23 }
 0x106   :  { %203 = vrsqrt.f32 %v141_v24 }
 0x113   :  { %v204_v29 = vpop.eup %203 }
 0x114   :  { %v143_v30 = vmul.f32 %v204_v29, %v140_v27 }
 0x116   :  { %v145_v32 = vmul.f32 %v143_v30, %v130_v14  ;;  %v151_v33 = vrot.slane %v143_v30, %v150_v28 }
 0x118   :  { %v146_v34 = vsub.f32 %v144_v31, %v145_v32  ;;  %v153_v35 = vmul.f32 %v151_v33, %v119_v6 }
 0x11a   :  { %v158_v36 = vrot.slane %v146_v34, %v150_v28 }
 0x11c   :  { %v160_v37 = vadd.f32 %v158_v36, %v153_v35 }
 0x11e   :  { %v161_v38 = vmax.f32 %v160_v37, 0.0 }
 0x120   :  { %162 = vst [vmem:[#allocation7] sm:$0xff] %v161_v38 }
 0x121   :  { %256 = shalt.err (!%p253_p0)
}
 0x122   :  { %172 = dma.vmem_to_hbm [thread:$0]  %s170_s30, 128, %s322_s4, [#allocation4]  }
 0x123   :  { %269 = dma.done.wait [#allocation4], 128  }
 0x124   :  { %270 = vsyncadd [#allocation4], 4294967168 }
 0x125   :  { %176 = vsyncpa [#allocation3], 1 }
 0x126   :  { %177 = vsyncpa [#allocation6], 1 }
 0x127   :  { %178 = vsyncpa [#allocation4], 1 }

</bundles_post_ra>
